<compile_context>
chip_gen: v5e
topology: v5e:2x2
jax: 0.10.0
libtpu: 0.0.40
codegen_flags: <defaults>
</compile_context>

<pallas_src>
import math

import jax
import jax.numpy as jnp
from jax.experimental import pallas as pl
from jax.experimental.pallas import tpu as pltpu

# ---- small shapes consistent with the module's use in transformer.py ----
D_MODEL = 32
MAX_LEN = 5000   # PyTorch default max_len
SEQ = 8
BATCH = 2

_VMEM_LIMIT_BYTES = 32 * 1024 * 1024    # safe on v5e/v6e (128 MiB) and v7x (64 MiB)
_TARGET_BLOCK_BYTES = 4 * 1024 * 1024   # ~4 MiB blocks -> <=~24 MiB double-buffered set


def make_positional_encoding(max_len: int, d_model: int) -> jnp.ndarray:
    """Sinusoidal PE table identical to the PyTorch buffer (shape (max_len, d_model))."""
    position = jnp.arange(max_len, dtype=jnp.float32)[:, None]
    div_term = jnp.exp(
        jnp.arange(0, d_model, 2, dtype=jnp.float32) * -(math.log(10000.0) / d_model)
    )
    pe = jnp.zeros((max_len, d_model), dtype=jnp.float32)
    pe = pe.at[:, 0::2].set(jnp.sin(position * div_term))
    pe = pe.at[:, 1::2].set(jnp.cos(position * div_term))
    return pe


# -------------------- Pallas kernel --------------------
def _add_kernel(x_ref, pe_ref, o_ref):
    # Works for both layouts:
    #   tiled path:   x (rows, D)  + pe (rows, D)     (same block shape)
    #   fallback path: x (B, S*D)  + pe (1, S*D)      (PE broadcasts over batch)
    o_ref[...] = x_ref[...] + pe_ref[...]


def _pick_block_rows(S: int, D: int, itemsize: int,
                     target_bytes: int = _TARGET_BLOCK_BYTES) -> int:
    """Largest multiple of 8 that divides S with block bytes <= target."""
    best = 8
    r = 8
    while r <= S:
        if S % r == 0 and r * D * itemsize <= target_bytes:
            best = r
        r += 8
    return best


class PositionalEncoding:
    """JAX/Pallas equivalent of the PyTorch PositionalEncoding module."""

    def __init__(self, d_model: int, max_len: int = 5000):
        self.d_model = d_model
        self.max_len = max_len
        # register_buffer-style: built once at setup time, in plain JAX.
        self.pe = make_positional_encoding(max_len, d_model)
        self._slab_cache = {}  # (S, dtype, layout) -> prepared PE slab

    def _prepared_pe(self, S: int, dtype, layout: str) -> jnp.ndarray:
        key = (S, jnp.dtype(dtype).name, layout)
        slab = self._slab_cache.get(key)
        if slab is None:
            pe = self.pe[:S].astype(dtype)  # slice + cast ONCE, not per call
            slab = pe if layout == "rows" else pe.reshape(1, S * self.d_model)
            self._slab_cache[key] = slab
        return slab

    def __call__(self, x: jnp.ndarray) -> jnp.ndarray:
        B, S, D = x.shape
        if D != self.d_model:
            raise ValueError(f"expected last dim {self.d_model}, got {D}")
        if S > self.max_len:
            raise ValueError(f"sequence length {S} exceeds max_len {self.max_len}")

        compiler_params = pltpu.CompilerParams(
            dimension_semantics=("parallel",),
            vmem_limit_bytes=_VMEM_LIMIT_BYTES,
        )

        if D % 128 == 0 and S % 8 == 0:
            # Scale-ready path: (B*S, D) slab, multi-step pipelined grid over
            # rows so DMA-in of step i+1 overlaps writeback of step i-1.
            pe = self._prepared_pe(S, x.dtype, "rows")          # (S, D)
            x2 = x.reshape(B * S, D)
            rows = _pick_block_rows(S, D, x2.dtype.itemsize)
            period = S // rows                                   # PE repeats every S rows
            grid = (B * S // rows,)
            out2 = pl.pallas_call(
                _add_kernel,
                out_shape=jax.ShapeDtypeStruct((B * S, D), x.dtype),
                grid=grid,
                in_specs=[
                    pl.BlockSpec((rows, D), lambda i: (i, 0)),
                    pl.BlockSpec((rows, D), lambda i: (i % period, 0)),
                ],
                out_specs=pl.BlockSpec((rows, D), lambda i: (i, 0)),
                input_output_aliases={0: 0},   # in-place add on the x slab
                compiler_params=compiler_params,
            )(x2, pe)
            return out2.reshape(B, S, D)

        # Small-dim fallback (e.g. d_model=32): one lane-dense slab, single step.
        # At this payload the op is pure launch overhead; in production it should
        # be fused into the adjacent embedding / first-attention kernel.
        pe2 = self._prepared_pe(S, x.dtype, "slab")              # (1, S*D)
        x2 = x.reshape(B, S * D)
        out2 = pl.pallas_call(
            _add_kernel,
            out_shape=jax.ShapeDtypeStruct((B, S * D), x.dtype),
            grid=(1,),
            in_specs=[
                pl.BlockSpec((B, S * D), lambda i: (0, 0)),
                pl.BlockSpec((1, S * D), lambda i: (0, 0)),
            ],
            out_specs=pl.BlockSpec((B, S * D), lambda i: (0, 0)),
            input_output_aliases={0: 0},       # in-place add on the x slab
            compiler_params=compiler_params,
        )(x2, pe2)
        return out2.reshape(B, S, D)


if __name__ == "__main__":
    key = jax.random.PRNGKey(0)
    k1, k2 = jax.random.split(key)

    # --- toy shape from transformer.py (small-D fallback path) ---
    posenc_small = PositionalEncoding(D_MODEL, MAX_LEN)
    x_small = jax.random.normal(k1, (BATCH, SEQ, D_MODEL), dtype=jnp.float32)
    # compute references BEFORE the (input-aliasing) kernel calls
    ref_small = x_small + posenc_small.pe[None, :SEQ, :]
    out_small = jax.block_until_ready(posenc_small(x_small))

    # --- scale-ready path (D % 128 == 0, S % 8 == 0) at a small size ---
    posenc_big = PositionalEncoding(128, 64)
    x_big = jax.random.normal(k2, (2, 16, 128), dtype=jnp.float32)
    ref_big = x_big + posenc_big.pe[None, :16, :]
    out_big = jax.block_until_ready(posenc_big(x_big))

    assert out_small.shape == (BATCH, SEQ, D_MODEL) and out_small.dtype == x_small.dtype
    assert jnp.allclose(out_small, ref_small, rtol=1e-6, atol=1e-6)
    assert out_big.shape == (2, 16, 128) and out_big.dtype == x_big.dtype
    assert jnp.allclose(out_big, ref_big, rtol=1e-6, atol=1e-6)

    print("KERNEL_OK")
</pallas_src>

<mosaic_0001>
module attributes {stable_mosaic.version = 11 : i64} {
  func.func @_add_kernel(%arg0: i32, %arg1: memref<2x256xf32, #tpu.memory_space<vmem>>, %arg2: memref<1x256xf32, #tpu.memory_space<vmem>>, %arg3: memref<2x256xf32, #tpu.memory_space<vmem>>) attributes {dimension_semantics = [#tpu.dimension_semantics<parallel>], iteration_bounds = array<i64: 1>, scalar_prefetch = 0 : i64, scratch_operands = 0 : i64, tpu.core_type = #tpu.core_type<tc>, window_params = [{pipeline_mode = #tpu.pipeline_mode<synchronous>, transform_indices = @transform_0, window_bounds = array<i64: 2, 256>}, {pipeline_mode = #tpu.pipeline_mode<synchronous>, transform_indices = @transform_1, window_bounds = array<i64: 1, 256>}, {pipeline_mode = #tpu.pipeline_mode<synchronous>, transform_indices = @transform_2, window_bounds = array<i64: 2, 256>}]} {
    %c0 = arith.constant 0 : index
    %c0_0 = arith.constant 0 : index
    %0 = vector.load %arg1[%c0, %c0_0] : memref<2x256xf32, #tpu.memory_space<vmem>>, vector<2x256xf32>
    %c0_1 = arith.constant 0 : index
    %c0_2 = arith.constant 0 : index
    %1 = vector.load %arg2[%c0_1, %c0_2] : memref<1x256xf32, #tpu.memory_space<vmem>>, vector<1x256xf32>
    %2 = vector.broadcast %1 : vector<1x256xf32> to vector<2x256xf32>
    %3 = arith.addf %0, %2 : vector<2x256xf32>
    %c0_3 = arith.constant 0 : index
    %c0_4 = arith.constant 0 : index
    %4 = vector.load %arg3[%c0_3, %c0_4] : memref<2x256xf32, #tpu.memory_space<vmem>>, vector<2x256xf32>
    tpu.vector_store %arg3[%c0_3, %c0_4], %3 {strides = array<i32>} : memref<2x256xf32, #tpu.memory_space<vmem>>, vector<2x256xf32>,
    return
  }
  func.func @transform_0(%arg0: i32) -> (i32, i32) {
    %c0_i32 = arith.constant 0 : i32
    %c0_i32_0 = arith.constant 0 : i32
    %c0_i32_1 = arith.constant 0 : i32
    return %c0_i32, %c0_i32_0 : i32, i32
  }
  func.func @transform_1(%arg0: i32) -> (i32, i32) {
    %c0_i32 = arith.constant 0 : i32
    %c0_i32_0 = arith.constant 0 : i32
    %c0_i32_1 = arith.constant 0 : i32
    return %c0_i32, %c0_i32_0 : i32, i32
  }
  func.func @transform_2(%arg0: i32) -> (i32, i32) {
    %c0_i32 = arith.constant 0 : i32
    %c0_i32_0 = arith.constant 0 : i32
    %c0_i32_1 = arith.constant 0 : i32
    return %c0_i32, %c0_i32_0 : i32, i32
  }
}

</mosaic_0001>

<bundles_post_ra>
// kernel: tpu_custom_call.1
= control target key start
LH: loop header
LB: loop body
LE: loop exit
PB: predicated region body
PF: predicated region fallthrough
CT: control target
= control target key end

     0   :  { %7 = vsyncpa [#allocation3], 0  ;;  %s134_s0 = inlined_call_operand.hbm [shape: f32[2,256], index: 0, kind: input, shape index: {}, may-alias: {0,2}]   ;;  %s135_s1 = inlined_call_operand.vmem [shape: f32[1,256], index: 1, kind: input, shape index: {}]   ;;  %s136_s2 = inlined_call_operand.hbm [shape: f32[2,256], index: 2, kind: output, shape index: {}, may-alias: {0,2}]  }
   0x1   :  { %8 = vsyncpa [#allocation4], 0  ;;  %s14_s11 = sshll.u32 %s134_s0, 4  ;;  %s108_s12 = smov [#allocation2]   ;;  %s15_s11 = int_to_ptr.hbm [resolvable:$true] %s14_s11 }
   0x2   :  { %s16_s13 = sshll.u32 %s108_s12, 4  ;;  %s17_s13 = int_to_ptr.vmem [resolvable:$true] %s16_s13 }
   0x3   :  { %19 = dma.hbm_to_vmem [thread:$0]  %s15_s11, 64, %s17_s13, [#allocation3]  }
   0x4   :  { %104 = dma.done.wait [#allocation3], 64  }
   0x5   :  { %105 = vsyncadd [#allocation3], 4294967232  ;;  %v27_v0 = vld [vmem:[%s135_s1] sm:$0x3]  ;;  %vm32_vm0 = vcmask 1041408   ;;  %s109_s16 = smov [#allocation5]  }
   0x6   :  { %v29_v1 = vperm.slane %v27_v0, 0  ;;  %v30_v2 = vperm.slane %v27_v0, 1  ;;  %v26_v3 = vld [vmem:[#allocation2] sm:$0xf]  ;;  %s42_s17 = sshll.u32 %s109_s16, 4  ;;  %s44_s19 = sshll.u32 %s136_s2, 4  ;;  %s43_s17 = int_to_ptr.vmem [resolvable:$true] %s42_s17  ;;  %s45_s19 = int_to_ptr.hbm [resolvable:$true] %s44_s19 }
   0x8   :  { %v31_v4 = vrot.slane %v30_v2, 6 }
   0xa   :  { %v33_v5 = vsel %vm32_vm0, %v29_v1, %v31_v4 }
   0xb   :  { %v35_v6 = vadd.f32 %v33_v5, %v26_v3 }
   0xd   :  { %36 = vst [vmem:[#allocation5] sm:$0xf] %v35_v6 }
   0xe   :  { %47 = dma.vmem_to_hbm [thread:$0]  %s43_s17, 64, %s45_s19, [#allocation4]  }
   0xf   :  { %106 = dma.done.wait [#allocation4], 64  }
  0x10   :  { %107 = vsyncadd [#allocation4], 4294967232 }
  0x11   :  { %52 = vsyncpa [#allocation3], 1 }
  0x12   :  { %53 = vsyncpa [#allocation4], 1 }

</bundles_post_ra>
